<compile_context>
chip_gen: v6e
topology: v6e:2x2x1
jax: 0.10.0
libtpu: 0.0.40
codegen_flags: <defaults>
</compile_context>

<pallas_src>
import math
from functools import partial

import jax
import jax.numpy as jnp
from jax import lax
from jax.experimental import pallas as pl
from jax.experimental.pallas import tpu as pltpu


def _round_up(v, t):
    return ((v + t - 1) // t) * t


def _finalize_cos(acc, inv_x, inv_w, label, j, tn, sin_m, cos_m, s, has_label):
    """Turn an f32 matmul tile into (optionally margin-adjusted) logits."""
    cos = acc * (inv_x * inv_w)                                   # (tm, tn)
    if has_label:
        col = lax.broadcasted_iota(jnp.int32, cos.shape, 1) + j * tn
        one_hot = col == label                                    # (tm, tn)
        # Margin math only on the label column: one sqrt per row.  Rows whose
        # label lives in another cout-tile select nothing and fall through to
        # plain `cos` via the jnp.where below.
        cos_lab = jnp.max(jnp.where(one_hot, cos, -2.0), axis=1, keepdims=True)
        sin_lab = jnp.sqrt(jnp.maximum(1.0 - cos_lab * cos_lab, 0.0))
        angle_sum = cos_lab * cos_m - sin_lab * sin_m             # (tm, 1)
        cos = jnp.where(one_hot, angle_sum, cos) * s
    return cos


def _arcface_kernel_single_k(*refs, sin_m, cos_m, s, tn, has_label):
    # Whole contraction dim in one tile: grid (i, j), no scratch, no pl.when.
    if has_label:
        x_ref, wt_ref, inv_x_ref, inv_w_ref, label_ref, out_ref = refs
        label = label_ref[...]
    else:
        x_ref, wt_ref, inv_x_ref, inv_w_ref, out_ref = refs
        label = None
    j = pl.program_id(1)
    acc = jnp.dot(x_ref[...], wt_ref[...], preferred_element_type=jnp.float32)
    cos = _finalize_cos(acc, inv_x_ref[...], inv_w_ref[...], label, j, tn,
                        sin_m, cos_m, s, has_label)
    out_ref[...] = cos.astype(out_ref.dtype)


def _arcface_kernel_multi_k(*refs, sin_m, cos_m, s, tn, has_label):
    # grid (i, j, k) with f32 VMEM accumulator; init/finalize via pl.when.
    if has_label:
        x_ref, wt_ref, inv_x_ref, inv_w_ref, label_ref, out_ref, acc_ref = refs
    else:
        x_ref, wt_ref, inv_x_ref, inv_w_ref, out_ref, acc_ref = refs
        label_ref = None

    # program_id / num_programs hoisted OUT of pl.when bodies (compile fix).
    j = pl.program_id(1)
    k = pl.program_id(2)
    nk = pl.num_programs(2)

    @pl.when(k == 0)
    def _init():
        acc_ref[...] = jnp.zeros_like(acc_ref)

    acc_ref[...] += jnp.dot(x_ref[...], wt_ref[...],
                            preferred_element_type=jnp.float32)

    @pl.when(k == nk - 1)
    def _finalize():
        label = label_ref[...] if has_label else None
        cos = _finalize_cos(acc_ref[...], inv_x_ref[...], inv_w_ref[...],
                            label, j, tn, sin_m, cos_m, s, has_label)
        out_ref[...] = cos.astype(out_ref.dtype)


def prepare_arcface_weights(weight, *, tn=1024, tk=None,
                            matmul_dtype=jnp.bfloat16):
    """One-off HBM passes over W (norms, transpose, cast, pad).

    Cache the returned dict across forward calls; the weight is static within
    a step, so these passes should not be repeated per batch.
    """
    cout, cin = weight.shape
    wf = weight.astype(jnp.float32)
    inv_w = lax.rsqrt(jnp.sum(wf * wf, axis=1, keepdims=True)).T   # (1, cout)

    # Lane-dense output: tn a multiple of 128.
    tn = _round_up(max(128, min(int(tn), _round_up(cout, 128))), 128)
    Np = _round_up(cout, tn)

    # Contraction tiling: take the whole (padded) cin when reasonable so the
    # k grid axis (and the accumulator read-modify-write) disappears.
    Kp = _round_up(cin, 128)
    if tk is None:
        tk = Kp if Kp <= 2048 else 512
    tk = min(_round_up(int(tk), 128), Kp)
    Kp = _round_up(Kp, tk)

    wt = jnp.pad(weight.T.astype(matmul_dtype),
                 ((0, Kp - cin), (0, Np - cout)))                  # (Kp, Np)
    inv_w = jnp.pad(inv_w, ((0, 0), (0, Np - cout)))               # pad -> 0
    return dict(wt=wt, inv_w=inv_w, cin=cin, cout=cout, Kp=Kp, Np=Np,
                tk=tk, tn=tn, matmul_dtype=matmul_dtype)


def arcface_forward(x, weight, label=None, *, s=30.0, m=0.3,
                    tm=512, tn=1024, tk=None,
                    matmul_dtype=jnp.bfloat16, out_dtype=jnp.float32):
    """ArcFace forward.

    x: (B, cin) f32; weight: (cout, cin) f32 OR a dict from
    prepare_arcface_weights(); label: optional (B,) int.
    Returns (B, cout): s * margin-adjusted cos if label is given, else cos.
    """
    prep = weight if isinstance(weight, dict) else prepare_arcface_weights(
        weight, tn=tn, tk=tk, matmul_dtype=matmul_dtype)

    B, cin = x.shape
    assert cin == prep["cin"], (cin, prep["cin"])
    Kp, Np, tk, tn = prep["Kp"], prep["Np"], prep["tk"], prep["tn"]
    matmul_dtype = prep["matmul_dtype"]
    cout = prep["cout"]
    has_label = label is not None

    sin_m = math.sin(m)
    cos_m = math.cos(m)

    # bf16 packs 2 rows per sublane -> tm multiple of 16 (8 for f32).
    align_m = 16 if jnp.dtype(matmul_dtype).itemsize < 4 else 8
    tm = _round_up(max(align_m, min(int(tm), _round_up(B, align_m))), align_m)
    Bp = _round_up(B, tm)

    # Per-batch reciprocal norms (cheap; weight norms come pre-computed).
    xf = x.astype(jnp.float32)
    inv_x = lax.rsqrt(jnp.sum(xf * xf, axis=1, keepdims=True))     # (B, 1)
    inv_x = jnp.pad(inv_x, ((0, Bp - B), (0, 0)))                  # pad -> 0
    x_mm = jnp.pad(x.astype(matmul_dtype), ((0, Bp - B), (0, Kp - cin)))

    nI, nJ, nK = Bp // tm, Np // tn, Kp // tk
    single_k = nK == 1

    operands = [x_mm, prep["wt"], inv_x, prep["inv_w"]]
    if has_label:
        label2d = jnp.pad(jnp.asarray(label).astype(jnp.int32).reshape(B, 1),
                          ((0, Bp - B), (0, 0)))
        operands.append(label2d)

    if single_k:
        grid = (nI, nJ)
        in_specs = [
            pl.BlockSpec((tm, Kp), lambda i, j: (i, 0)),   # x tile
            pl.BlockSpec((Kp, tn), lambda i, j: (0, j)),   # W.T tile
            pl.BlockSpec((tm, 1), lambda i, j: (i, 0)),    # 1/||x||
            pl.BlockSpec((1, tn), lambda i, j: (0, j)),    # 1/||w||
        ]
        if has_label:
            in_specs.append(pl.BlockSpec((tm, 1), lambda i, j: (i, 0)))
        out_spec = pl.BlockSpec((tm, tn), lambda i, j: (i, j))
        scratch = []
        kernel = partial(_arcface_kernel_single_k, sin_m=sin_m, cos_m=cos_m,
                         s=float(s), tn=tn, has_label=has_label)
        dim_sem = ("parallel", "parallel")
    else:
        grid = (nI, nJ, nK)
        in_specs = [
            pl.BlockSpec((tm, tk), lambda i, j, k: (i, k)),
            pl.BlockSpec((tk, tn), lambda i, j, k: (k, j)),
            pl.BlockSpec((tm, 1), lambda i, j, k: (i, 0)),
            pl.BlockSpec((1, tn), lambda i, j, k: (0, j)),
        ]
        if has_label:
            in_specs.append(pl.BlockSpec((tm, 1), lambda i, j, k: (i, 0)))
        out_spec = pl.BlockSpec((tm, tn), lambda i, j, k: (i, j))
        scratch = [pltpu.VMEM((tm, tn), jnp.float32)]
        kernel = partial(_arcface_kernel_multi_k, sin_m=sin_m, cos_m=cos_m,
                         s=float(s), tn=tn, has_label=has_label)
        dim_sem = ("parallel", "parallel", "arbitrary")

    mm_bytes = jnp.dtype(matmul_dtype).itemsize
    out_bytes = jnp.dtype(out_dtype).itemsize
    tk_blk = Kp if single_k else tk
    vmem_need = (2 * tm * tk_blk * mm_bytes            # x (double buffered)
                 + 2 * tk_blk * tn * mm_bytes          # W.T
                 + 2 * tm * tn * out_bytes             # output
                 + 2 * 4 * (2 * tm + tn)               # inv_x / inv_w / label
                 + (0 if single_k else tm * tn * 4))   # accumulator scratch
    vmem_limit = int(min(max(vmem_need + (8 << 20), 32 << 20), 100 << 20))

    bytes_accessed = (Bp * Kp * mm_bytes * nJ          # x re-streamed per j
                      + Kp * Np * mm_bytes * nI        # W re-streamed per i
                      + Bp * Np * out_bytes            # output writeback
                      + (2 * Bp + Np) * 4)             # norms + labels
    cost = pl.CostEstimate(flops=2 * Bp * Kp * Np,
                           transcendentals=(Bp * nJ if has_label else 0),
                           bytes_accessed=bytes_accessed)

    out_padded = pl.pallas_call(
        kernel,
        out_shape=jax.ShapeDtypeStruct((Bp, Np), out_dtype),
        grid_spec=pltpu.PrefetchScalarGridSpec(
            num_scalar_prefetch=0,
            grid=grid,
            in_specs=in_specs,
            out_specs=out_spec,
            scratch_shapes=scratch,
        ),
        compiler_params=pltpu.CompilerParams(
            dimension_semantics=dim_sem,
            vmem_limit_bytes=vmem_limit),
        cost_estimate=cost,
    )(*operands)

    return out_padded[:B, :cout]


if __name__ == "__main__":
    # Small shapes consistent with the module: batch=16, cin=384, cout=250.
    B, cin, cout = 16, 384, 250
    s, m = 30.0, 0.3

    key = jax.random.PRNGKey(0)
    kx, kw, kl = jax.random.split(key, 3)
    x = jax.random.normal(kx, (B, cin), dtype=jnp.float32)
    bound = 1.0 / math.sqrt(cin)            # mimic nn.Linear uniform init
    weight = jax.random.uniform(kw, (cout, cin), dtype=jnp.float32,
                                minval=-bound, maxval=bound)
    label = jax.random.randint(kl, (B,), 0, cout, dtype=jnp.int32)

    # Pure-JAX references.
    inv_x_r = 1.0 / jnp.linalg.norm(x, axis=1, keepdims=True)
    inv_w_r = (1.0 / jnp.linalg.norm(weight, axis=1, keepdims=True)).T

    def ref_cos(mm_dtype):
        logits = jnp.dot(x.astype(mm_dtype), weight.T.astype(mm_dtype),
                         preferred_element_type=jnp.float32)
        return logits * inv_x_r * inv_w_r

    def ref_margin(cos_r):
        one_hot = jax.nn.one_hot(label, cout, dtype=jnp.float32)
        sin_r = jnp.sqrt(jnp.maximum(1.0 - cos_r ** 2, 0.0))
        ang = cos_r * math.cos(m) - sin_r * math.sin(m)
        return (ang * one_hot + cos_r * (1.0 - one_hot)) * s

    # 1) bf16 MXU path; weights prepared once (cacheable); small tiles force a
    #    multi-tile (i=1, j=2, k=3) grid to exercise padding + k accumulation.
    prep_small = prepare_arcface_weights(weight, tn=128, tk=128)
    out = jax.block_until_ready(
        arcface_forward(x, prep_small, label, s=s, m=m, tm=16))
    assert out.shape == (B, cout)
    ref_bf16 = ref_margin(ref_cos(jnp.bfloat16))
    assert jnp.allclose(out, ref_bf16, atol=2e-3, rtol=2e-3), \
        float(jnp.max(jnp.abs(out - ref_bf16)))
    # Loose sanity check against the full-f32 analytic reference.
    assert jnp.allclose(out, ref_margin(ref_cos(jnp.float32)), atol=0.15)

    # 2) Default tiles (single-k, single-tile grid), no label -> plain cosine.
    out_nl = jax.block_until_ready(arcface_forward(x, weight, None, s=s, m=m))
    assert jnp.allclose(out_nl, ref_cos(jnp.bfloat16), atol=2e-3, rtol=2e-3)

    # 3) f32 MXU path, multi-k grid (loose tol covers precision-mode diffs).
    out32 = jax.block_until_ready(
        arcface_forward(x, weight, label, s=s, m=m, tm=8, tn=128, tk=128,
                        matmul_dtype=jnp.float32))
    assert jnp.allclose(out32, ref_margin(ref_cos(jnp.float32)), atol=0.1)

    print("KERNEL_OK")
</pallas_src>

<mosaic_0001>
module attributes {stable_mosaic.version = 11 : i64} {
  func.func @_arcface_kernel_multi_k(%arg0: i32, %arg1: i32, %arg2: i32, %arg3: memref<16x128xbf16, #tpu.memory_space<vmem>>, %arg4: memref<128x128xbf16, #tpu.memory_space<vmem>>, %arg5: memref<16x1xf32, #tpu.memory_space<vmem>>, %arg6: memref<1x128xf32, #tpu.memory_space<vmem>>, %arg7: memref<16x1xi32, #tpu.memory_space<vmem>>, %arg8: memref<16x128xf32, #tpu.memory_space<vmem>>, %arg9: memref<16x128xf32, #tpu.memory_space<vmem>>) attributes {dimension_semantics = [#tpu.dimension_semantics<parallel>, #tpu.dimension_semantics<parallel>, #tpu.dimension_semantics<arbitrary>], iteration_bounds = array<i64: 1, 2, 3>, scalar_prefetch = 0 : i64, scratch_operands = 1 : i64, tpu.core_type = #tpu.core_type<tc>, window_params = [{transform_indices = @transform_0, window_bounds = array<i64: 16, 128>}, {transform_indices = @transform_1, window_bounds = array<i64: 128, 128>}, {transform_indices = @transform_2, window_bounds = array<i64: 16, 1>}, {transform_indices = @transform_3, window_bounds = array<i64: 1, 128>}, {transform_indices = @transform_4, window_bounds = array<i64: 16, 1>}, {transform_indices = @transform_5, window_bounds = array<i64: 16, 128>}]} {
    %c0_i32 = arith.constant 0 : i32
    %0 = arith.cmpi eq, %arg2, %c0_i32 : i32
    %1 = arith.extui %0 : i1 to i32
    %c0_i32_0 = arith.constant 0 : i32
    %2 = arith.cmpi ne, %1, %c0_i32_0 : i32
    scf.if %2 {
      %cst_9 = arith.constant 0.000000e+00 : f32
      %12 = vector.broadcast %cst_9 : f32 to vector<16x128xf32>
      %c0_10 = arith.constant 0 : index
      %c0_11 = arith.constant 0 : index
      %13 = vector.load %arg9[%c0_10, %c0_11] : memref<16x128xf32, #tpu.memory_space<vmem>>, vector<16x128xf32>
      tpu.vector_store %arg9[%c0_10, %c0_11], %12 {strides = array<i32>} : memref<16x128xf32, #tpu.memory_space<vmem>>, vector<16x128xf32>,
    } else {
    }
    %c0 = arith.constant 0 : index
    %c0_1 = arith.constant 0 : index
    %3 = vector.load %arg9[%c0, %c0_1] : memref<16x128xf32, #tpu.memory_space<vmem>>, vector<16x128xf32>
    %c0_2 = arith.constant 0 : index
    %c0_3 = arith.constant 0 : index
    %4 = vector.load %arg3[%c0_2, %c0_3] : memref<16x128xbf16, #tpu.memory_space<vmem>>, vector<16x128xbf16>
    %c0_4 = arith.constant 0 : index
    %c0_5 = arith.constant 0 : index
    %5 = vector.load %arg4[%c0_4, %c0_5] : memref<128x128xbf16, #tpu.memory_space<vmem>>, vector<128x128xbf16>
    %cst = arith.constant dense<0.000000e+00> : vector<16x128xf32>
    %6 = tpu.matmul %4, %5, %cst {dimension_numbers = #tpu.dot_dimension_numbers<[1], [0], [0], [1], [0, 0, 1, 1], [], []>} : vector<16x128xbf16>, vector<128x128xbf16>, vector<16x128xf32> -> vector<16x128xf32>
    %7 = arith.addf %3, %6 : vector<16x128xf32>
    %c0_6 = arith.constant 0 : index
    %c0_7 = arith.constant 0 : index
    %8 = vector.load %arg9[%c0_6, %c0_7] : memref<16x128xf32, #tpu.memory_space<vmem>>, vector<16x128xf32>
    tpu.vector_store %arg9[%c0_6, %c0_7], %7 {strides = array<i32>} : memref<16x128xf32, #tpu.memory_space<vmem>>, vector<16x128xf32>,
    %c2_i32 = arith.constant 2 : i32
    %9 = arith.cmpi eq, %arg2, %c2_i32 : i32
    %10 = arith.extui %9 : i1 to i32
    %c0_i32_8 = arith.constant 0 : i32
    %11 = arith.cmpi ne, %10, %c0_i32_8 : i32
    scf.if %11 {
      %c0_9 = arith.constant 0 : index
      %c0_10 = arith.constant 0 : index
      %12 = vector.load %arg7[%c0_9, %c0_10] : memref<16x1xi32, #tpu.memory_space<vmem>>, vector<16x1xi32>
      %c0_11 = arith.constant 0 : index
      %c0_12 = arith.constant 0 : index
      %13 = vector.load %arg9[%c0_11, %c0_12] : memref<16x128xf32, #tpu.memory_space<vmem>>, vector<16x128xf32>
      %c0_13 = arith.constant 0 : index
      %c0_14 = arith.constant 0 : index
      %14 = vector.load %arg5[%c0_13, %c0_14] : memref<16x1xf32, #tpu.memory_space<vmem>>, vector<16x1xf32>
      %c0_15 = arith.constant 0 : index
      %c0_16 = arith.constant 0 : index
      %15 = vector.load %arg6[%c0_15, %c0_16] : memref<1x128xf32, #tpu.memory_space<vmem>>, vector<1x128xf32>
      %16 = vector.broadcast %14 : vector<16x1xf32> to vector<16x128xf32>
      %17 = vector.broadcast %15 : vector<1x128xf32> to vector<16x128xf32>
      %18 = arith.mulf %16, %17 : vector<16x128xf32>
      %19 = arith.mulf %13, %18 : vector<16x128xf32>
      %20 = tpu.iota {dimensions = array<i32: 1>} : vector<16x128xi32>
      %c128_i32 = arith.constant 128 : i32
      %21 = arith.muli %arg1, %c128_i32 : i32
      %22 = vector.broadcast %21 : i32 to vector<16x128xi32>
      %23 = arith.addi %20, %22 : vector<16x128xi32>
      %24 = vector.broadcast %12 : vector<16x1xi32> to vector<16x128xi32>
      %25 = arith.cmpi eq, %23, %24 : vector<16x128xi32>
      %cst_17 = arith.constant -2.000000e+00 : f32
      %26 = vector.broadcast %cst_17 : f32 to vector<16x128xf32>
      %27 = arith.select %25, %19, %26 : vector<16x128xi1>, vector<16x128xf32>
      %cst_18 = arith.constant dense<0xFF800000> : vector<16xf32>
      %28 = vector.multi_reduction <maximumf>, %27, %cst_18 [1] : vector<16x128xf32> to vector<16xf32>
      %29 = vector.shape_cast %28 : vector<16xf32> to vector<16x1xf32>
      %30 = arith.mulf %29, %29 : vector<16x1xf32>
      %cst_19 = arith.constant 1.000000e+00 : f32
      %31 = vector.broadcast %cst_19 : f32 to vector<16x1xf32>
      %32 = arith.subf %31, %30 : vector<16x1xf32>
      %cst_20 = arith.constant 0.000000e+00 : f32
      %33 = vector.broadcast %cst_20 : f32 to vector<16x1xf32>
      %34 = arith.maximumf %32, %33 : vector<16x1xf32>
      %35 = math.sqrt %34 : vector<16x1xf32>
      %cst_21 = arith.constant 0.955336511 : f32
      %36 = vector.broadcast %cst_21 : f32 to vector<16x1xf32>
      %37 = arith.mulf %29, %36 : vector<16x1xf32>
      %cst_22 = arith.constant 0.295520216 : f32
      %38 = vector.broadcast %cst_22 : f32 to vector<16x1xf32>
      %39 = arith.mulf %35, %38 : vector<16x1xf32>
      %40 = arith.subf %37, %39 : vector<16x1xf32>
      %41 = vector.shape_cast %40 : vector<16x1xf32> to vector<16x1xf32>
      %42 = vector.broadcast %41 : vector<16x1xf32> to vector<16x128xf32>
      %43 = arith.select %25, %42, %19 : vector<16x128xi1>, vector<16x128xf32>
      %cst_23 = arith.constant 3.000000e+01 : f32
      %44 = vector.broadcast %cst_23 : f32 to vector<16x128xf32>
      %45 = arith.mulf %43, %44 : vector<16x128xf32>
      %c0_24 = arith.constant 0 : index
      %c0_25 = arith.constant 0 : index
      %46 = vector.load %arg8[%c0_24, %c0_25] : memref<16x128xf32, #tpu.memory_space<vmem>>, vector<16x128xf32>
      tpu.vector_store %arg8[%c0_24, %c0_25], %45 {strides = array<i32>} : memref<16x128xf32, #tpu.memory_space<vmem>>, vector<16x128xf32>,
    } else {
    }
    return
  }
  func.func @transform_0(%arg0: i32, %arg1: i32, %arg2: i32) -> (i32, i32) {
    %c0_i32 = arith.constant 0 : i32
    return %arg0, %arg2 : i32, i32
  }
  func.func @transform_1(%arg0: i32, %arg1: i32, %arg2: i32) -> (i32, i32) {
    %c0_i32 = arith.constant 0 : i32
    return %arg2, %arg1 : i32, i32
  }
  func.func @transform_2(%arg0: i32, %arg1: i32, %arg2: i32) -> (i32, i32) {
    %c0_i32 = arith.constant 0 : i32
    %c0_i32_0 = arith.constant 0 : i32
    return %arg0, %c0_i32 : i32, i32
  }
  func.func @transform_3(%arg0: i32, %arg1: i32, %arg2: i32) -> (i32, i32) {
    %c0_i32 = arith.constant 0 : i32
    %c0_i32_0 = arith.constant 0 : i32
    return %c0_i32, %arg1 : i32, i32
  }
  func.func @transform_4(%arg0: i32, %arg1: i32, %arg2: i32) -> (i32, i32) {
    %c0_i32 = arith.constant 0 : i32
    %c0_i32_0 = arith.constant 0 : i32
    return %arg0, %c0_i32 : i32, i32
  }
  func.func @transform_5(%arg0: i32, %arg1: i32, %arg2: i32) -> (i32, i32) {
    %c0_i32 = arith.constant 0 : i32
    return %arg0, %arg1 : i32, i32
  }
}

</mosaic_0001>

<bundles_post_ra>
// kernel: tpu_custom_call.1
= control target key start
LH: loop header
LB: loop body
LE: loop exit
PB: predicated region body
PF: predicated region fallthrough
CT: control target
= control target key end

     0   :  { %s1472_s0 = inlined_call_operand.vmem [shape: bf16[16,384], index: 0, kind: input, shape index: {}]   ;;  %s1473_s1 = inlined_call_operand.hbm [shape: bf16[384,256], index: 1, kind: input, shape index: {}]   ;;  %s1474_s2 = inlined_call_operand.vmem [shape: f32[16,1], index: 2, kind: input, shape index: {}]   ;;  %s1475_s3 = inlined_call_operand.vmem [shape: f32[1,256], index: 3, kind: input, shape index: {}]   ;;  %s1476_s4 = inlined_call_operand.vmem [shape: s32[16,1], index: 4, kind: input, shape index: {}]   ;;  %s1477_s5 = inlined_call_operand.hbm [shape: f32[16,256], index: 5, kind: output, shape index: {}]  }
   0x1   :  { %1485 = sst [smem:[#allocation19_spill]] %s1472_s0 }
   0x2   :  { %1486 = sst [smem:[#allocation20_spill]] %s1477_s5 }
   0x3   :  { %10 = vsyncpa [#allocation5], 0 }
   0x4   :  { %12 = vsyncpa [#allocation5 + $0x1], 0 }
   0x5   :  { %13 = vsyncpa [#allocation6], 0 }
   0x6   :  { %15 = vsyncpa [#allocation6 + $0x1], 0  ;;  %s1182_s18 = smov 0   ;;  %s1184_s19 = smov 0  }
   0x7   :  { %s1186_s20 = smov 0   ;;  %s1188_s21 = smov 0  }
   0x8   :  { %s1190_s22 = smov 0   ;;  %s1192_s23 = smov 0  }
   0x9   :  { %s1194_s24 = smov 0   ;;  %s1196_s25 = smov 0  }
   0xa   :  { %s1198_s26 = smov 0   ;;  %s1200_s27 = smov 0  }
   0xb   :  { %s1202_s28 = smov 0   ;;  %s1204_s29 = smov 0  }
   0xc   :  { %s1206_s30 = smov 0  }
   0xd LB: > { %1487 = sst [smem:[#allocation10_spill]] %s1090_s18  ;;  %s775_s6 = sadd.s32 4294967295, %s1138_s30   ;;  %s1138_s30 = sphi %s1206_s30, %s21_s30   ;;  %s1134_s29 = sphi %s1204_s29, %s1523_s29   ;;  %s1130_s28 = sphi %s1202_s28, %s1522_s28   ;;  %s1126_s27 = sphi %s1200_s27, %s1521_s27   ;;  %s1122_s26 = sphi %s1198_s26, %s1520_s26   ;;  %s1118_s25 = sphi %s1196_s25, %s1511_s25   ;;  %s1114_s24 = sphi %s1194_s24, %s1510_s24   ;;  %s1110_s23 = sphi %s1192_s23, %s1519_s23   ;;  %s1106_s22 = sphi %s1190_s22, %s1518_s22   ;;  %s1102_s21 = sphi %s1188_s21, %s1517_s21   ;;  %s1098_s20 = sphi %s1186_s20, %s1508_s20   ;;  %s1094_s19 = sphi %s1184_s19, %s1516_s19   ;;  %s1090_s18 = sphi %s1182_s18, %s1515_s18  }
   0xe   : > { %1488 = sst [smem:[#allocation11_spill]] %s1098_s20  ;;  %s33_s8 = sadd.s32 1, %s1130_s28 }
   0xf   : > { %1489 = sst [smem:[#allocation12_spill]] %s1118_s25  ;;  %s36_s9 = sadd.s32 1, %s1134_s29 }
  0x10   : > { %p34_p0 = scmp.ge.s32.totalorder %s33_s8, 3  ;;  %s49_s10 = sadd.s32 1, %s1118_s25 }
  0x11   : > { %p56_p1 = scmp.ne.s32.totalorder %s1118_s25, %s1114_s24  ;;  %p57_p2 = scmp.eq.s32.totalorder %s1138_s30, 0 }
  0x12   : > { %s1525_s8 = smov (%p34_p0, %s33_s8), 0  ;;  %s1527_s9 = smov (!%p34_p0, %s36_s9), %s1134_s29 }
  0x13   : > { %1490 = sst [smem:[#allocation13_spill]] %s1525_s8  ;;  %s45_s11 = ssub.s32 %s1130_s28, %s1525_s8 }
  0x14   : > { %p1260_p3 = por %p57_p2, %p56_p1  ;;  %p38_p4 = scmp.ge.s32.totalorder %s1527_s9, 2 }
  0x15   : > { %p47_p5 = scmp.eq.s32.totalorder %s45_s11, 0  ;;  %s77_s13 = sadd.s32 1, %s1110_s23 }
  0x16   : > { %p84_p6 = scmp.ne.s32.totalorder %s1110_s23, %s1106_s22  ;;  %s1529_s9 = smov (%p38_p4, %s1527_s9), 0 }
  0x17   : > { %1492 = sst [smem:[#allocation14_spill]] %s1529_s9  ;;  %s73_s15 = ssub.s32 %s1134_s29, %s1529_s9 }
  0x18   : > { %s1270_s14 = scalar_select %p47_p5, %s1118_s25, %s49_s10  }
  0x19   : > { %p1274_p7 = por %p84_p6, %p57_p2  ;;  %s74_s17 = sor.u32 %s73_s15, %s45_s11 }
  0x1a   : > { %1493 = sst [smem:[#allocation15_spill]] %s1270_s14  ;;  %p90_p8 = scmp.ne.s32.totalorder %s1106_s22, %s1102_s21 }
  0x1b   : > { %p75_p9 = scmp.eq.s32.totalorder %s74_s17, 0  ;;  %p91_p10 = scmp.eq.s32.totalorder %s775_s6, 0 }
  0x1c   : > { %p181_p11 = scmp.eq.s32.totalorder %s73_s15, 0  ;;  %s183_s7 = sadd.s32 1, %s1098_s20 }
  0x1d   : > { %s1284_s8 = scalar_select %p75_p9, %s1110_s23, %s77_s13  }
  0x1e   : > { %p1286_p12 = por %p91_p10, %p90_p8  ;;  %p193_p13 = scmp.ne.s32.totalorder %s1098_s20, %s1094_s19 }
  0x1f   : > { %1495 = sst [smem:[#allocation16_spill]] %s1284_s8  ;;  %p194_p0 = scmp.eq.s32.totalorder %s775_s6, 5 }
  0x20   : > { %s1293_s10 = scalar_select %p181_p11, %s1098_s20, %s183_s7  }
  0x21   : > { %p199_p1 = scmp.ne.s32.totalorder %s1094_s19, %s1090_s18  ;;  %s1498_s9 = sadd.s32 4294967294, %s1138_s30  }
  0x22   : > { %1497 = sst [smem:[#allocation17_spill]] %s1293_s10  ;;  %p200_p2 = scmp.eq.s32.totalorder %s1498_s9, 5 }
  0x23   : > { %p1301_p4 = por %p194_p0, %p193_p13  ;;  %p780_p6 = scmp.ge.s32.totalorder %s1138_s30, 6 }
  0x24   : > { %p1305_p5 = por %p200_p2, %p199_p1 }
  0x25   : > { %234 = sbr.rel (%p780_p6) target bundleno = 71 (0x47), region = 24 }
  0x26   : > { %s1500_s11 = scalar_select %p1305_p5, 1, 0 }
  0x28   : > { %1501 = sst [smem:[#allocation18_spill]] %s1500_s11 }
  0x2a   : > { %237 = sbr.rel (!%p1260_p3) target bundleno = 53 (0x35), region = 28  ;;  %s239_s6 = sand.u32 (%p1260_p3), 1, %s1118_s25  }
  0x2b   : > { %s782_s7 = sshll.u32 (%p1260_p3), %s1130_s28, 2  ;;  %s781_s13 = sshll.u32 (%p1260_p3), %s239_s6, 3 }
  0x2c   : > { %s1502_s0 = sld [smem:[#allocation19_spill]] (%p1260_p3)  ;;  %s241_s14 = scalar_lea.vmem (%p1260_p3), [#allocation3], %s781_s13 }
  0x32   : > { %s246_s17 = scalar_lea.vmem %s1502_s0, %s782_s7 }
  0x33   : > { %v263_v0 = vld [vmem:[%s246_s17] sm:$0xf]  ;;  %v265_v1 = vld [vmem:[%s246_s17 + $0xc] sm:$0xf] }
  0x34   : > { %264 = vst [vmem:[%s241_s14] sm:$0xf] %v263_v0  ;;  %266 = vst [vmem:[%s241_s14 + $0x4] sm:$0xf] %v265_v1 }
  0x35 PF: > { %s295_s12 = sand.u32 1, %s1110_s23   ;;  %s808_s8 = sshll.u32 %s1130_s28, 5 }
  0x36   : > { %s783_s10 = sshll.u32 %s295_s12, 6  ;;  %s305_s25 = sadd.s32 %s1134_s29, %s808_s8 }
  0x37   : > { %s786_s20 = sshll.u32 %s305_s25, 6  ;;  %s299_s6 = scalar_lea.vmem [#allocation4], %s783_s10 }
  0x38   : > { %s308_s11 = sshll.u32 %s299_s6, 4  ;;  %s307_s7 = scalar_lea.hbm %s1473_s1, %s786_s20  ;;  %s309_s11 = int_to_ptr.vmem [resolvable:$true] %s308_s11 }
  0x39   : > { %s296_s13 = scalar_lea.sflag [#allocation5], %s295_s12  ;;  %s988_s15 = scalar_lea.vmem %s309_s11, 1024 }
  0x3a   : > { %p989_p3 = scmp.ne.s32.totalorder %s309_s11, %s988_s15  ;;  %s1140_s14 = smov [#allocation4]  }
  0x3b   : > { %s992_s17 = sshll.u32 %s1140_s14, 4  ;;  %s993_s17 = int_to_ptr.vmem [resolvable:$false] %s992_s17 }
  0x3c   : > { %p990_p8 = pnand %p989_p3, %p1274_p7  ;;  %s994_s0 = scalar_lea.vmem %s993_s17, 2048 }
  0x3d   : > { %p995_p10 = scmp.lt.s32.totalorder %s309_s11, %s993_s17  ;;  %p996_p11 = scmp.lt.s32.totalorder %s994_s0, %s988_s15 }
  0x3e   : > { %p991_p9 = pneg %p990_p8 }
  0x3f   : > { %p997_p13 = por %p996_p11, %p995_p10 }
  0x41   : > { %p998_p0 = pnand %p997_p13, %p991_p9 }
  0x43   : > { %1001 = shalt.err (!%p998_p0)
}
  0x44   : > { %s1141_s25 = smov 128   ;;  %s1142_s18 = smov 64  }
  0x45   : > { %s1143_s20 = smov 4  }
  0x46   : > { %838 = dma.hbm_to_vmem [thread:$0]  (%p1274_p7), %s307_s7, 1024, %s309_s11, %s296_s13, %s1141_s25, %s1142_s18, %s1143_s20  }
  0x47 PF: > { %p787_p1 = scmp.ge.s32.totalorder %s1138_s30, 1  ;;  %p322_p2 = scmp.lt.s32.totalorder %s1138_s30, 7 }
  0x49   : > { %p323_p6 = pnand %p787_p1, %p322_p2 }
  0x4a   : > { %s329_s0 = sand.u32 (!%p323_p6), 1, %s1114_s24   ;;  %s335_s8 = sand.u32 (!%p323_p6), 1, %s1106_s22  }
  0x4b   : > { %326 = sbr.rel (%p323_p6) target bundleno = 654 (0x28e), region = 77  ;;  %s1331_s10 = sshll.u32 (!%p323_p6), %s329_s0, 3 }
  0x4c   : > { %s789_s12 = sshll.u32 (!%p323_p6), %s335_s8, 6  ;;  %s331_s6 = scalar_lea.vmem (!%p323_p6), [#allocation3], %s1331_s10 }
  0x4d   : > { %s336_s9 = scalar_lea.sflag (!%p323_p6), [#allocation5], %s335_s8  ;;  %s1334_s16 = scalar_lea.vmem (!%p323_p6), [#allocation4], %s789_s12 }
  0x50   : > { %1081 = dma.done.wait (%p1286_p12), %s336_s9, 1024  }
  0x51   : > { %1083 = vsyncadd (%p1286_p12), %s336_s9, 4294966272  ;;  %s380_s11 = sand.u32 1, %s1094_s19   ;;  %p391_p7 = scmp.lt.s32.totalorder %s1126_s27, 1 }
  0x52   : > { %s790_s24 = sshll.u32 %s380_s11, 4  ;;  %p791_p3 = scmp.ne.s32.totalorder %s1122_s26, 0 }
  0x53   : > { %s1345_s7 = scalar_select %p391_p7, %s1126_s27, 1 }
  0x54   : > { %s1351_s17 = scalar_lea.vmem [#allocation7], %s790_s24  ;;  %405 = sbr.rel (%p791_p3) target bundleno = 91 (0x5b), region = 89 }
  0x55   : > { %s393_s14 = scalar_lea.vmem %s1475_s3, %s1345_s7 }
  0x59   : > { %v1144_v2 = vmov 0.0  }
  0x5a   : > { %406 = vst [vmem:[#allocation2] sm:$0xff] %v1144_v2  ;;  %407 = vst [vmem:[#allocation2 + $0x8] sm:$0xff] %v1144_v2 }
  0x5b PF: > { %v961_v3 = vld [vmem:[%s1334_s16 + $0x38] sm:$0xff]   ;;  %v1145_v4 = vmov 0.0   ;;  %v962_v5 = vld [vmem:[%s1334_s16 + $0x30] sm:$0xff]   ;;  %vm1146_vm0 = vmmov 0   ;;  %v963_v6 = vld [vmem:[%s1334_s16 + $0x28] sm:$0xff]   ;;  %p801_p12 = scmp.ne.s32.totalorder %s1122_s26, 2 }
  0x5c   : > { %818 = vmatprep.subr.bf16.mxu0 %v1145_v4  ;;  %834 = vmatprep.mubr.msk.bf16.mxu0 %vm1146_vm0, %v1145_v4  ;;  %v964_v7 = vld [vmem:[%s1334_s16 + $0x20] sm:$0xff]   ;;  %v965_v8 = vld [vmem:[%s1334_s16 + $0x18] sm:$0xff]   ;;  %v966_v9 = vld [vmem:[%s1334_s16 + $0x10] sm:$0xff]   ;;  %s803_s12 = sshll.u32 (!%p801_p12), %s1126_s27, 7 }
  0x5d   : > { %819 = vmatpush3.bf16.msra.mxu0 %v961_v3  ;;  %v967_v10 = vld [vmem:[%s1334_s16 + $0x8] sm:$0xff]   ;;  %v968_v11 = vld [vmem:[%s1334_s16] sm:$0xff]   ;;  %v969_v12 = vld [vmem:[%s331_s6] sm:$0xff]  }
  0x5e   : > { %820 = vmatprep.subr.bf16.mxu0 %v1145_v4 }
  0x61   : > { %821 = vmatpush3.bf16.msra.mxu0 %v962_v5  ;;  %v408_v13 = vld [vmem:[#allocation2] sm:$0xff]  ;;  %v409_v17 = vld [vmem:[#allocation2 + $0x8] sm:$0xff] }
  0x62   : > { %822 = vmatprep.subr.bf16.mxu0 %v1145_v4 }
  0x65   : > { %823 = vmatpush3.bf16.msra.mxu0 %v963_v6 }
  0x66   : > { %824 = vmatprep.subr.bf16.mxu0 %v1145_v4 }
  0x69   : > { %825 = vmatpush3.bf16.msra.mxu0 %v964_v7 }
  0x6a   : > { %826 = vmatprep.subr.bf16.mxu0 %v1145_v4 }
  0x6d   : > { %827 = vmatpush3.bf16.msra.mxu0 %v965_v8 }
  0x6e   : > { %828 = vmatprep.subr.bf16.mxu0 %v1145_v4 }
  0x71   : > { %829 = vmatpush3.bf16.msra.mxu0 %v966_v9 }
  0x72   : > { %830 = vmatprep.subr.bf16.mxu0 %v1145_v4 }
  0x75   : > { %831 = vmatpush3.bf16.msra.mxu0 %v967_v10 }
  0x76   : > { %832 = vmatprep.subr.bf16.mxu0 %v1145_v4 }
  0x79   : > { %833 = vmatpush3.bf16.msra.mxu0 %v968_v11 }
  0x7c   : > { %835 = vmatmul.mubr.bf16.vlgmr.msra.gmra.mxu0 %v969_v12 }
 0x13c   : > { %v516_v14 = vpop.f32.mrf.mxu0 }
 0x13d   : > { %v523_v15 = vadd.f32 %v516_v14, %v408_v13 }
 0x13e   : > { %v836_v16 = vpop.f32.mrf.mxu0 }
 0x13f   : > { %525 = vst [vmem:[#allocation2] sm:$0xff] %v523_v15  ;;  %530 = sbr.rel (%p801_p12) target bundleno = 629 (0x275), region = 93 }
 0x140   : > { %v519_v18 = vpop.f32.mrf.mxu0 }
 0x141   : > { %v524_v19 = vadd.f32 %v519_v18, %v409_v17 }
 0x142   : > { %v837_v20 = vpop.f32.mrf.mxu0 }
 0x143   : > { %526 = vst [vmem:[#allocation2 + $0x8] sm:$0xff] %v524_v19 }
 0x144   : > { %v535_v21 = vld [vmem:[%s1474_s2] sm:$0xff]  ;;  %v1147_v23 = vmov 0   ;;  %v536_v24 = vld [vmem:[%s1474_s2 + $0x8] sm:$0xff]  ;;  %v558_v26 = vlaneseq  ;;  %v561_v28 = vstv %s803_s12 }
 0x145   : > { %v531_v22 = vld [vmem:[%s1476_s4] sm:$0xff]  ;;  %971 = vset.pattern.permute.xlu1 %v1147_v23  ;;  %970 = vset.pattern.permute.xlu0 %v1147_v23  ;;  %v532_v25 = vld [vmem:[%s1476_s4 + $0x8] sm:$0xff] }
 0x146   : > { %540 = vperm.xlu0 %970, %v535_v21   ;;  %564 = vperm.xlu1 %971, %v531_v22   ;;  %v559_v27 = vand.u32 127, %v558_v26  ;;  %v802_v29 = vld [vmem:[%s393_s14] ss:$0 sm:$0xff] }
 0x147   : > { %v533_v33 = vld [vmem:[#allocation2] sm:$0xff] }
 0x148   : > { %v562_v30 = vadd.s32 %v561_v28, %v559_v27 }
 0x14a   : > { %545 = vperm.xlu0 %970, %v536_v24   ;;  %567 = vperm.xlu1 %971, %v532_v25   ;;  %v534_v37 = vld [vmem:[#allocation2 + $0x8] sm:$0xff] }
 0x1c1   : > { %v541_v31 = vpop.permute.xlu0 %540  ;;  %v565_v32 = vpop.permute.xlu1 %564 }
 0x1c2   : > { %v554_v34 = vmul.f32 %v802_v29, %v541_v31  ;;  %vm569_vm1 = vcmp.eq.s32.totalorder %v562_v30, %v565_v32 }
 0x1c4   : > { %v556_v35 = vmul.f32 %v554_v34, %v533_v33 }
 0x1c5   : > { %v546_v36 = vpop.permute.xlu0 %545  ;;  %v568_v39 = vpop.permute.xlu1 %567 }
 0x1c6   : > { %v555_v38 = vmul.f32 %v802_v29, %v546_v36  ;;  %v571_v40 = vsel %vm569_vm1, %v556_v35, -2.0  ;;  %vm570_vm2 = vcmp.eq.s32.totalorder %v562_v30, %v568_v39 }
 0x1c7   : > { %573 = vmax.xlane.f32.xlu0 %v571_v40 }
 0x1c8   : > { %v557_v41 = vmul.f32 %v555_v38, %v534_v37 }
 0x1ca   : > { %v572_v42 = vsel %vm570_vm2, %v557_v41, -2.0 }
 0x1cb   : > { %575 = vmax.xlane.f32.xlu1 %v572_v42 }
 0x250   : > { %v574_v43 = vpop.xlane.xlu0 %573 }
 0x251   : > { %v577_v44 = vmul.f32 %v574_v43, %v574_v43  ;;  %v597_v57 = vmul.f32 0.9553365, %v574_v43 }
 0x253   : > { %v579_v45 = vsub.f32 1.0, %v577_v44 }
 0x254   : > { %v576_v46 = vpop.xlane.xlu1 %575 }
 0x255   : > { %v581_v47 = vmax.f32 %v579_v45, 0.0  ;;  %v578_v48 = vmul.f32 %v576_v46, %v576_v46  ;;  %v598_v2 = vmul.f32 0.9553365, %v576_v46 }
 0x257   : > { %972 = vrsqrt.f32 %v581_v47  ;;  %v580_v49 = vsub.f32 1.0, %v578_v48  ;;  %vm585_vm3 = vcmp.eq.f32.partialorder %v581_v47, inf  ;;  %v588_v53 = vand.u32 2147483648, %v581_v47 }
 0x258   : > { %vm587_vm4 = vcmp.eq.f32.partialorder %v581_v47, 0.0 }
 0x259   : > { %v582_v50 = vmax.f32 %v580_v49, 0.0 }
 0x25b   : > { %974 = vrsqrt.f32 %v582_v50  ;;  %vm592_vm5 = vcmp.eq.f32.partialorder %v582_v50, inf  ;;  %v595_v61 = vand.u32 2147483648, %v582_v50  ;;  %vm594_vm6 = vcmp.eq.f32.partialorder %v582_v50, 0.0 }
 0x264   : > { %v973_v51 = vpop.eup %972 }
 0x265   : > { %v584_v52 = vmul.f32 %v973_v51, %v581_v47 }
 0x267   : > { %v586_v54 = vsel %vm585_vm3, %v581_v47, %v584_v52 }
 0x268   : > { %v589_v55 = vsel %vm587_vm4, %v588_v53, %v586_v54  ;;  %v975_v56 = vpop.eup %974 }
 0x269   : > { %v599_v58 = vmul.f32 0.29552022, %v589_v55  ;;  %v591_v59 = vmul.f32 %v975_v56, %v582_v50 }
 0x26b   : > { %v601_v60 = vsub.f32 %v597_v57, %v599_v58  ;;  %v593_v62 = vsel %vm592_vm5, %v582_v50, %v591_v59 }
 0x26c   : > { %v596_v0 = vsel %vm594_vm6, %v595_v61, %v593_v62 }
 0x26d   : > { %v603_v63 = vsel %vm569_vm1, %v601_v60, %v556_v35  ;;  %v600_v3 = vmul.f32 0.29552022, %v596_v0 }
 0x26e   : > { %v605_v1 = vmul.f32 30.0, %v603_v63 }
 0x26f   : > { %v602_v4 = vsub.f32 %v598_v2, %v600_v3 }
 0x270   : > { %607 = vst [vmem:[%s1351_s17] sm:$0xff] %v605_v1 }
 0x271   : > { %v604_v5 = vsel %vm570_vm2, %v602_v4, %v557_v41 }
 0x272   : > { %v606_v6 = vmul.f32 30.0, %v604_v5 }
 0x274   : > { %608 = vst [vmem:[%s1351_s17 + $0x8] sm:$0xff] %v606_v6 }
 0x275 PF: > { %s805_s16 = sshll.u32 %s1126_s27, 7  ;;  %s1503_s13 = sld [smem:[#allocation20_spill]] }
 0x276   : > { %s625_s14 = sshll.u32 %s1351_s17, 4  ;;  %s1400_s5 = scalar_lea.sflag [#allocation6], %s380_s11  ;;  %s1396_s14 = int_to_ptr.vmem [resolvable:$true] %s625_s14 }
 0x277   : > { %s1002_s25 = scalar_lea.vmem %s1396_s14, 256  ;;  %s1148_s27 = smov [#allocation7]  }
 0x278   : > { %p1003_p8 = scmp.ne.s32.totalorder %s1396_s14, %s1002_s25  ;;  %s1006_s18 = sshll.u32 %s1148_s27, 4  ;;  %s1007_s18 = int_to_ptr.vmem [resolvable:$false] %s1006_s18 }
 0x279   : > { %s1008_s20 = scalar_lea.vmem %s1007_s18, 512  ;;  %p1009_p11 = scmp.lt.s32.totalorder %s1396_s14, %s1007_s18 }
 0x27a   : > { %p1004_p9 = pnand %p1003_p8, %p1301_p4  ;;  %p1010_p13 = scmp.lt.s32.totalorder %s1008_s20, %s1002_s25 }
 0x27b   : > { %s1393_s15 = scalar_lea.hbm %s1503_s13, %s805_s16 }
 0x27c   : > { %p1005_p10 = pneg %p1004_p9  ;;  %p1011_p0 = por %p1010_p13, %p1009_p11 }
 0x27e   : > { %p1012_p1 = pnand %p1011_p0, %p1005_p10 }
 0x280   : > { %1015 = shalt.err (!%p1012_p1)
}
 0x281   : > { %s1016_s11 = scalar_lea.hbm %s1393_s15, 256  ;;  %s1020_s8 = scalar_lea.hbm %s1503_s13, 512 }
 0x282   : > { %p1017_p2 = scmp.ne.s32.totalorder %s1393_s15, %s1016_s11  ;;  %p1021_p3 = scmp.lt.s32.totalorder %s1393_s15, %s1503_s13 }
 0x283   : > { %p1022_p12 = scmp.lt.s32.totalorder %s1020_s8, %s1016_s11 }
 0x284   : > { %p1018_p6 = pnand %p1017_p2, %p1301_p4 }
 0x285   : > { %p1023_p8 = por %p1022_p12, %p1021_p3 }
 0x286   : > { %p1019_p7 = pneg %p1018_p6 }
 0x288   : > { %p1024_p9 = pnand %p1023_p8, %p1019_p7 }
 0x28a   : > { %1027 = shalt.err (!%p1024_p9)
}
 0x28b   : > { %s1149_s12 = smov 128   ;;  %s1150_s6 = smov 256  }
 0x28c   : > { %s1151_s9 = smov 8  }
 0x28d   : > { %840 = dma.vmem_to_hbm [thread:$0]  (%p1301_p4), %s1396_s14, 256, %s1393_s15, %s1400_s5, %s1149_s12, %s1150_s6, %s1151_s9  }
 0x28e PF: > { %s1504_s16 = sld [smem:[#allocation10_spill]]  ;;  %p846_p10 = scmp.ge.s32.totalorder %s1138_s30, 2 }
 0x290   : > { %p843_p11 = pnand %p846_p10, %p1305_p5 }
 0x292   : > { %p844_p13 = pneg %p843_p11 }
 0x294   : > { %s640_s7 = sand.u32 1, %s1504_s16  }
 0x295   : > { %s641_s25 = scalar_lea.sflag [#allocation6], %s640_s7 }
 0x296   : > { %1085 = dma.done.wait (%p844_p13), %s641_s25, 256  }
 0x297   : > { %1087 = vsyncadd (%p844_p13), %s641_s25, 4294967040  ;;  %s21_s30 = sadd.s32 1, %s1138_s30   ;;  %s1507_s21 = sld [smem:[#allocation11_spill]] }
 0x298   : > { %p1428_p0 = scmp.ge.s32.totalorder %s21_s30, 8   ;;  %s1508_s20 = sld [smem:[#allocation17_spill]] }
 0x299   : > { %s1509_s15 = sld [smem:[#allocation16_spill]]  ;;  %s1515_s18 = smov %s1094_s19 }
 0x29a   : > { %s1510_s24 = sld [smem:[#allocation12_spill]]  ;;  %s1520_s26 = smov %s1130_s28 }
 0x29b   : > { %s1511_s25 = sld [smem:[#allocation15_spill]]  ;;  %s1521_s27 = smov %s1134_s29 }
 0x29c   : > { %s1512_s14 = sld [smem:[#allocation13_spill]] }
 0x29d   : > { %s1513_s5 = sld [smem:[#allocation14_spill]]  ;;  %s1516_s19 = smov %s1507_s21 }
 0x29e   : > { %s1517_s21 = smov %s1106_s22  ;;  %s1518_s22 = smov %s1110_s23 }
 0x29f   : > { %s1519_s23 = smov %s1509_s15  ;;  %20 = sbr.rel (!%p1428_p0) target bundleno = 13 (0xd), region = 151 }
 0x2a2   : > { %s1522_s28 = smov %s1512_s14 }
 0x2a3   : > { %s1523_s29 = smov %s1513_s5 }
 0x2a4   :  { %646 = vsyncpa [#allocation5], 1 }
 0x2a5   :  { %648 = vsyncpa [#allocation5 + $0x1], 1 }
 0x2a6   :  { %649 = vsyncpa [#allocation6], 1 }
 0x2a7   :  { %651 = vsyncpa [#allocation6 + $0x1], 1 }

</bundles_post_ra>
